<compile_context>
chip_gen: v6e
topology: v6e:2x2x1
jax: 0.10.0
libtpu: 0.0.40
codegen_flags: <defaults>
</compile_context>

<pallas_src>
import functools

import jax
import jax.numpy as jnp
from jax import lax
from jax.experimental import pallas as pl
from jax.experimental.pallas import tpu as pltpu


def _custom_loss_kernel(absent_ref, col_ref, y_ref, t_ref,
                        inter_ref, union_ref, pen_ref, *, smooth, W):
    """One batch element per grid step.

    Blocks:
      absent_ref : (B, C) int32, SMEM (1 = class absent in that batch element)
      col_ref    : (1, HW) int32, column index of each flattened pixel
      y_ref      : (1, C, HW) f32 predicted probabilities (assumed <= 1, like softmax; same
                   NaN behavior as the torch original otherwise)
      t_ref      : (1, 1, HW) int32 labels
      inter_ref  : (1, C, 1) f32  per-class sum(Y * onehot(T))      (this batch element)
      union_ref  : (1, C, 1) f32  per-class sum(Y^2 + onehot(T)^2)
      pen_ref    : (1, 1, 1) f32  absent-class + LV-boundary penalty
    """
    b = pl.program_id(0)
    Y = y_ref[0]                 # (C, HW) f32
    lab = t_ref[0]               # (1, HW) int32
    C, HW = Y.shape

    # ---- soft-dice partials: in-kernel one-hot + fused per-class reductions ----
    cls = lax.broadcasted_iota(jnp.int32, (C, HW), 0)
    mask = (lab == cls).astype(jnp.float32)                       # (C, HW) one-hot, built in-kernel
    inter_ref[0] = jnp.sum(Y * mask, axis=1, keepdims=True)       # (C, 1)
    union_ref[0] = jnp.sum(Y * Y + mask, axis=1, keepdims=True)   # (C, 1)  (mask^2 == mask)

    # ---- LV boundary penalty: separable 3x3 box sum via shift-and-add on the flat layout ----
    lane = lax.broadcasted_iota(jnp.int32, (1, HW), 1)
    col = col_ref[...]                                            # (1, HW)
    br = Y[0:1, :] + Y[1:2, :]                                    # BGR + RV
    up = jnp.where(lane >= W, pltpu.roll(br, shift=W, axis=1), 0.0)              # (r-1, c)
    dn = jnp.where(lane < HW - W, pltpu.roll(br, shift=HW - W, axis=1), 0.0)     # (r+1, c)
    vsum = br + up + dn
    lf = jnp.where(col > 0, pltpu.roll(vsum, shift=1, axis=1), 0.0)              # (r, c-1)
    rt = jnp.where(col < W - 1, pltpu.roll(vsum, shift=HW - 1, axis=1), 0.0)     # (r, c+1)
    box = vsum + lf + rt
    lv = Y[3:4, :]
    pen_ref[0] = jnp.sum(lv * box, keepdims=True)                 # (1, 1)

    # ---- absent-class penalty: log work only runs when the class is actually absent ----
    for c in range(1, C):
        yc = Y[c:c + 1, :]                                        # free value slice

        @pl.when(absent_ref[b, c] != 0)
        def _():
            neglog = -jnp.log(1.0 - yc + smooth)
            pen_ref[0] = pen_ref[0] + jnp.sum(neglog, keepdims=True)


def custom_loss(Y, T, class_weights=(1.0, 2.0, 4.0, 1.0), smooth=1e-6):
    """Pallas implementation of CustomLoss.forward(Y, T) -> scalar f32.

    Y: (B, C, H, W) float32 class probabilities.  T: (B, H, W) integer labels.
    """
    B, C, H, W = Y.shape
    assert C == 4, "CustomLoss assumes 4 classes [BGR, RV, MYO, LV]"
    HW = H * W

    Yf = Y.astype(jnp.float32).reshape(B, C, HW)      # contiguous reshape: no data movement
    Tf = T.astype(jnp.int32).reshape(B, 1, HW)

    # (B, C) absence table from the integer labels (cheap; no one-hot ever materialized).
    absent = jnp.stack(
        [jnp.all(Tf[:, 0, :] != c, axis=-1) for c in range(C)], axis=-1
    ).astype(jnp.int32)

    # Column index of each flattened pixel (avoids in-kernel vector int div/mod).
    colidx = jnp.tile(jnp.arange(W, dtype=jnp.int32), H).reshape(1, HW)

    kernel = functools.partial(_custom_loss_kernel, smooth=float(smooth), W=W)
    inter, union, pen = pl.pallas_call(
        kernel,
        grid=(B,),
        in_specs=[
            pl.BlockSpec(memory_space=pltpu.MemorySpace.SMEM),    # absence table (whole array)
            pl.BlockSpec((1, HW), lambda b: (0, 0)),              # column indices (constant block)
            pl.BlockSpec((1, C, HW), lambda b: (b, 0, 0)),        # Y, one batch element per step
            pl.BlockSpec((1, 1, HW), lambda b: (b, 0, 0)),        # labels
        ],
        out_specs=[
            pl.BlockSpec((1, C, 1), lambda b: (b, 0, 0)),         # dice intersection partials
            pl.BlockSpec((1, C, 1), lambda b: (b, 0, 0)),         # dice union partials
            pl.BlockSpec((1, 1, 1), lambda b: (b, 0, 0)),         # penalty partials
        ],
        out_shape=(
            jax.ShapeDtypeStruct((B, C, 1), jnp.float32),
            jax.ShapeDtypeStruct((B, C, 1), jnp.float32),
            jax.ShapeDtypeStruct((B, 1, 1), jnp.float32),
        ),
        compiler_params=pltpu.CompilerParams(
            dimension_semantics=("parallel",),     # batch shards across the 2 TCs on v7x
            vmem_limit_bytes=32 * 1024 * 1024,
        ),
    )(absent, colidx, Yf, Tf)

    # O(C) finalize in glue: combine per-batch partials into the scalar loss.
    w = jnp.asarray(class_weights, jnp.float32)
    inter_c = jnp.sum(inter[:, :, 0], axis=0)     # (C,)
    union_c = jnp.sum(union[:, :, 0], axis=0)     # (C,)
    dice = jnp.sum(w * (1.0 - (2.0 * inter_c + smooth) / (union_c + smooth)))
    return dice + jnp.sum(pen)


def custom_loss_ref(Y, T, class_weights=(1.0, 2.0, 4.0, 1.0), smooth=1e-6):
    """Pure-JAX reference mirroring the PyTorch module."""
    B, C, H, W = Y.shape
    w = jnp.asarray(class_weights, jnp.float32)
    Tz = jnp.transpose(jax.nn.one_hot(T, C, dtype=jnp.float32), (0, 3, 1, 2))
    loss = jnp.float32(0.0)
    for c in range(C):
        yc, tc = Y[:, c], Tz[:, c]
        inter = jnp.sum(yc * tc)
        union = jnp.sum(yc ** 2 + tc ** 2)
        loss += w[c] * (1.0 - (2.0 * inter + smooth) / (union + smooth))
    for c in range(1, C):
        absent = jnp.all(Tz[:, c] == 0, axis=(1, 2))
        per_b = jnp.sum(-jnp.log(1.0 - Y[:, c] + smooth), axis=(1, 2))
        loss += jnp.sum(jnp.where(absent, per_b, 0.0))
    lv = Y[:, 3]
    br = Y[:, 0] + Y[:, 1]
    brp = jnp.pad(br, ((0, 0), (1, 1), (1, 1)))
    box = sum(brp[:, di:di + H, dj:dj + W] for di in range(3) for dj in range(3))
    loss += jnp.sum(lv * box)
    return loss


if __name__ == "__main__":
    key = jax.random.PRNGKey(0)
    k1, k2 = jax.random.split(key)
    B, C, H, W = 2, 4, 16, 16

    logits = jax.random.normal(k1, (B, C, H, W), dtype=jnp.float32)
    Y = jax.nn.softmax(logits, axis=1)                              # predicted probabilities
    T = jax.random.randint(k2, (B, H, W), 0, C, dtype=jnp.int32)    # ground-truth labels
    # Make classes 2 and 3 absent in batch element 1 to exercise the absent-class penalty.
    T = T.at[1].set(jnp.minimum(T[1], 1))

    loss = custom_loss(Y, T)
    jax.block_until_ready(loss)

    ref = custom_loss_ref(Y, T)
    assert jnp.allclose(loss, ref, rtol=2e-3, atol=2e-3), (float(loss), float(ref))
    print("KERNEL_OK")
</pallas_src>

<mosaic_0001>
module attributes {stable_mosaic.version = 11 : i64} {
  func.func @_custom_loss_kernel(%arg0: i32, %arg1: memref<2x4xi32, #tpu.memory_space<smem>>, %arg2: memref<1x256xi32, #tpu.memory_space<vmem>>, %arg3: memref<1x4x256xf32, #tpu.memory_space<vmem>>, %arg4: memref<1x1x256xi32, #tpu.memory_space<vmem>>, %arg5: memref<1x4x1xf32, #tpu.memory_space<vmem>>, %arg6: memref<1x4x1xf32, #tpu.memory_space<vmem>>, %arg7: memref<1x1x1xf32, #tpu.memory_space<vmem>>) attributes {dimension_semantics = [#tpu.dimension_semantics<parallel>], iteration_bounds = array<i64: 2>, scalar_prefetch = 0 : i64, scratch_operands = 0 : i64, tpu.core_type = #tpu.core_type<tc>, window_params = [{transform_indices = @transform_0, window_bounds = array<i64: 2, 4>}, {pipeline_mode = #tpu.pipeline_mode<synchronous>, transform_indices = @transform_1, window_bounds = array<i64: 1, 256>}, {transform_indices = @transform_2, window_bounds = array<i64: 1, 4, 256>}, {transform_indices = @transform_3, window_bounds = array<i64: 1, 1, 256>}, {transform_indices = @transform_4, window_bounds = array<i64: 1, 4, 1>}, {transform_indices = @transform_5, window_bounds = array<i64: 1, 4, 1>}, {transform_indices = @transform_6, window_bounds = array<i64: 1, 1, 1>}]} {
    %c0 = arith.constant 0 : index
    %c0_0 = arith.constant 0 : index
    %c0_1 = arith.constant 0 : index
    %0 = vector.load %arg3[%c0, %c0_0, %c0_1] : memref<1x4x256xf32, #tpu.memory_space<vmem>>, vector<1x4x256xf32>
    %1 = vector.shape_cast %0 : vector<1x4x256xf32> to vector<4x256xf32>
    %c0_2 = arith.constant 0 : index
    %c0_3 = arith.constant 0 : index
    %c0_4 = arith.constant 0 : index
    %2 = vector.load %arg4[%c0_2, %c0_3, %c0_4] : memref<1x1x256xi32, #tpu.memory_space<vmem>>, vector<1x1x256xi32>
    %3 = vector.shape_cast %2 : vector<1x1x256xi32> to vector<1x256xi32>
    %4 = tpu.iota {dimensions = array<i32: 0>} : vector<4x256xi32>
    %5 = vector.broadcast %3 : vector<1x256xi32> to vector<4x256xi32>
    %6 = arith.cmpi eq, %5, %4 : vector<4x256xi32>
    %7 = arith.extui %6 : vector<4x256xi1> to vector<4x256xi32>
    %8 = arith.sitofp %7 : vector<4x256xi32> to vector<4x256xf32>
    %9 = arith.mulf %1, %8 : vector<4x256xf32>
    %cst = arith.constant dense<0.000000e+00> : vector<4xf32>
    %10 = vector.multi_reduction <add>, %9, %cst [1] : vector<4x256xf32> to vector<4xf32>
    %11 = vector.shape_cast %10 : vector<4xf32> to vector<4x1xf32>
    %c0_5 = arith.constant 0 : index
    %c0_6 = arith.constant 0 : index
    %c0_7 = arith.constant 0 : index
    %12 = vector.load %arg5[%c0_5, %c0_6, %c0_7] : memref<1x4x1xf32, #tpu.memory_space<vmem>>, vector<1x4x1xf32>
    %13 = vector.shape_cast %12 : vector<1x4x1xf32> to vector<4x1xf32>
    %14 = vector.shape_cast %11 : vector<4x1xf32> to vector<1x4x1xf32>
    tpu.vector_store %arg5[%c0_5, %c0_6, %c0_7], %14 {strides = array<i32>} : memref<1x4x1xf32, #tpu.memory_space<vmem>>, vector<1x4x1xf32>,
    %15 = arith.mulf %1, %1 : vector<4x256xf32>
    %16 = arith.addf %15, %8 : vector<4x256xf32>
    %cst_8 = arith.constant dense<0.000000e+00> : vector<4xf32>
    %17 = vector.multi_reduction <add>, %16, %cst_8 [1] : vector<4x256xf32> to vector<4xf32>
    %18 = vector.shape_cast %17 : vector<4xf32> to vector<4x1xf32>
    %c0_9 = arith.constant 0 : index
    %c0_10 = arith.constant 0 : index
    %c0_11 = arith.constant 0 : index
    %19 = vector.load %arg6[%c0_9, %c0_10, %c0_11] : memref<1x4x1xf32, #tpu.memory_space<vmem>>, vector<1x4x1xf32>
    %20 = vector.shape_cast %19 : vector<1x4x1xf32> to vector<4x1xf32>
    %21 = vector.shape_cast %18 : vector<4x1xf32> to vector<1x4x1xf32>
    tpu.vector_store %arg6[%c0_9, %c0_10, %c0_11], %21 {strides = array<i32>} : memref<1x4x1xf32, #tpu.memory_space<vmem>>, vector<1x4x1xf32>,
    %22 = tpu.iota {dimensions = array<i32: 1>} : vector<1x256xi32>
    %c0_12 = arith.constant 0 : index
    %c0_13 = arith.constant 0 : index
    %23 = vector.load %arg2[%c0_12, %c0_13] : memref<1x256xi32, #tpu.memory_space<vmem>>, vector<1x256xi32>
    %24 = vector.extract_strided_slice %1 {offsets = [0, 0], sizes = [1, 256], strides = [1, 1]} : vector<4x256xf32> to vector<1x256xf32>
    %25 = vector.extract_strided_slice %1 {offsets = [1, 0], sizes = [1, 256], strides = [1, 1]} : vector<4x256xf32> to vector<1x256xf32>
    %26 = arith.addf %24, %25 : vector<1x256xf32>
    %c16_i32 = arith.constant 16 : i32
    %27 = vector.broadcast %c16_i32 : i32 to vector<1x256xi32>
    %28 = arith.cmpi sge, %22, %27 : vector<1x256xi32>
    %c16_i32_14 = arith.constant 16 : i32
    %29 = tpu.dynamic_rotate %26 by %c16_i32_14 dim 1 : vector<1x256xf32>, i32 -> vector<1x256xf32>
    %cst_15 = arith.constant 0.000000e+00 : f32
    %30 = vector.broadcast %cst_15 : f32 to vector<1x256xf32>
    %31 = arith.select %28, %29, %30 : vector<1x256xi1>, vector<1x256xf32>
    %c240_i32 = arith.constant 240 : i32
    %32 = vector.broadcast %c240_i32 : i32 to vector<1x256xi32>
    %33 = arith.cmpi slt, %22, %32 : vector<1x256xi32>
    %c240_i32_16 = arith.constant 240 : i32
    %34 = tpu.dynamic_rotate %26 by %c240_i32_16 dim 1 : vector<1x256xf32>, i32 -> vector<1x256xf32>
    %cst_17 = arith.constant 0.000000e+00 : f32
    %35 = vector.broadcast %cst_17 : f32 to vector<1x256xf32>
    %36 = arith.select %33, %34, %35 : vector<1x256xi1>, vector<1x256xf32>
    %37 = arith.addf %26, %31 : vector<1x256xf32>
    %38 = arith.addf %37, %36 : vector<1x256xf32>
    %c0_i32 = arith.constant 0 : i32
    %39 = vector.broadcast %c0_i32 : i32 to vector<1x256xi32>
    %40 = arith.cmpi sgt, %23, %39 : vector<1x256xi32>
    %c1_i32 = arith.constant 1 : i32
    %41 = tpu.dynamic_rotate %38 by %c1_i32 dim 1 : vector<1x256xf32>, i32 -> vector<1x256xf32>
    %cst_18 = arith.constant 0.000000e+00 : f32
    %42 = vector.broadcast %cst_18 : f32 to vector<1x256xf32>
    %43 = arith.select %40, %41, %42 : vector<1x256xi1>, vector<1x256xf32>
    %c15_i32 = arith.constant 15 : i32
    %44 = vector.broadcast %c15_i32 : i32 to vector<1x256xi32>
    %45 = arith.cmpi slt, %23, %44 : vector<1x256xi32>
    %c255_i32 = arith.constant 255 : i32
    %46 = tpu.dynamic_rotate %38 by %c255_i32 dim 1 : vector<1x256xf32>, i32 -> vector<1x256xf32>
    %cst_19 = arith.constant 0.000000e+00 : f32
    %47 = vector.broadcast %cst_19 : f32 to vector<1x256xf32>
    %48 = arith.select %45, %46, %47 : vector<1x256xi1>, vector<1x256xf32>
    %49 = arith.addf %38, %43 : vector<1x256xf32>
    %50 = arith.addf %49, %48 : vector<1x256xf32>
    %51 = vector.extract_strided_slice %1 {offsets = [3, 0], sizes = [1, 256], strides = [1, 1]} : vector<4x256xf32> to vector<1x256xf32>
    %52 = arith.mulf %51, %50 : vector<1x256xf32>
    %53 = vector.shape_cast %52 : vector<1x256xf32> to vector<1x1x256xf32>
    %cst_20 = arith.constant dense<0.000000e+00> : vector<1xf32>
    %54 = vector.multi_reduction <add>, %53, %cst_20 [1, 2] : vector<1x1x256xf32> to vector<1xf32>
    %55 = vector.shape_cast %54 : vector<1xf32> to vector<1x1x1xf32>
    %56 = vector.extract %55[0, 0, 0] : f32 from vector<1x1x1xf32>
    %57 = vector.broadcast %56 : f32 to vector<1x1xf32>
    %c0_21 = arith.constant 0 : index
    %c0_22 = arith.constant 0 : index
    %c0_23 = arith.constant 0 : index
    %58 = vector.load %arg7[%c0_21, %c0_22, %c0_23] : memref<1x1x1xf32, #tpu.memory_space<vmem>>, vector<1x1x1xf32>
    %59 = vector.shape_cast %58 : vector<1x1x1xf32> to vector<1x1xf32>
    %60 = vector.shape_cast %57 : vector<1x1xf32> to vector<1x1x1xf32>
    tpu.vector_store %arg7[%c0_21, %c0_22, %c0_23], %60 {strides = array<i32>} : memref<1x1x1xf32, #tpu.memory_space<vmem>>, vector<1x1x1xf32>,
    %61 = vector.extract_strided_slice %1 {offsets = [1, 0], sizes = [1, 256], strides = [1, 1]} : vector<4x256xf32> to vector<1x256xf32>
    %62 = arith.index_cast %arg0 : i32 to index
    %c1 = arith.constant 1 : index
    %63 = memref.load %arg1[%62, %c1] : memref<2x4xi32, #tpu.memory_space<smem>>
    %c0_i32_24 = arith.constant 0 : i32
    %64 = arith.cmpi ne, %63, %c0_i32_24 : i32
    %65 = arith.extui %64 : i1 to i32
    %c0_i32_25 = arith.constant 0 : i32
    %66 = arith.cmpi ne, %65, %c0_i32_25 : i32
    scf.if %66 {
      %cst_30 = arith.constant 1.000000e+00 : f32
      %79 = vector.broadcast %cst_30 : f32 to vector<1x256xf32>
      %80 = arith.subf %79, %61 : vector<1x256xf32>
      %cst_31 = arith.constant 9.99999997E-7 : f32
      %81 = vector.broadcast %cst_31 : f32 to vector<1x256xf32>
      %82 = arith.addf %80, %81 : vector<1x256xf32>
      %83 = math.log %82 : vector<1x256xf32>
      %cst_32 = arith.constant 0.000000e+00 : f32
      %84 = vector.broadcast %cst_32 : f32 to vector<1x256xf32>
      %85 = arith.subf %84, %83 : vector<1x256xf32>
      %c0_33 = arith.constant 0 : index
      %c0_34 = arith.constant 0 : index
      %c0_35 = arith.constant 0 : index
      %86 = vector.load %arg7[%c0_33, %c0_34, %c0_35] : memref<1x1x1xf32, #tpu.memory_space<vmem>>, vector<1x1x1xf32>
      %87 = vector.shape_cast %86 : vector<1x1x1xf32> to vector<1x1xf32>
      %88 = vector.shape_cast %85 : vector<1x256xf32> to vector<1x1x256xf32>
      %cst_36 = arith.constant dense<0.000000e+00> : vector<1xf32>
      %89 = vector.multi_reduction <add>, %88, %cst_36 [1, 2] : vector<1x1x256xf32> to vector<1xf32>
      %90 = vector.shape_cast %89 : vector<1xf32> to vector<1x1x1xf32>
      %91 = vector.extract %90[0, 0, 0] : f32 from vector<1x1x1xf32>
      %92 = vector.broadcast %91 : f32 to vector<1x1xf32>
      %93 = arith.addf %87, %92 : vector<1x1xf32>
      %c0_37 = arith.constant 0 : index
      %c0_38 = arith.constant 0 : index
      %c0_39 = arith.constant 0 : index
      %94 = vector.load %arg7[%c0_37, %c0_38, %c0_39] : memref<1x1x1xf32, #tpu.memory_space<vmem>>, vector<1x1x1xf32>
      %95 = vector.shape_cast %94 : vector<1x1x1xf32> to vector<1x1xf32>
      %96 = vector.shape_cast %93 : vector<1x1xf32> to vector<1x1x1xf32>
      tpu.vector_store %arg7[%c0_37, %c0_38, %c0_39], %96 {strides = array<i32>} : memref<1x1x1xf32, #tpu.memory_space<vmem>>, vector<1x1x1xf32>,
    } else {
    }
    %67 = vector.extract_strided_slice %1 {offsets = [2, 0], sizes = [1, 256], strides = [1, 1]} : vector<4x256xf32> to vector<1x256xf32>
    %68 = arith.index_cast %arg0 : i32 to index
    %c2 = arith.constant 2 : index
    %69 = memref.load %arg1[%68, %c2] : memref<2x4xi32, #tpu.memory_space<smem>>
    %c0_i32_26 = arith.constant 0 : i32
    %70 = arith.cmpi ne, %69, %c0_i32_26 : i32
    %71 = arith.extui %70 : i1 to i32
    %c0_i32_27 = arith.constant 0 : i32
    %72 = arith.cmpi ne, %71, %c0_i32_27 : i32
    scf.if %72 {
      %cst_30 = arith.constant 1.000000e+00 : f32
      %79 = vector.broadcast %cst_30 : f32 to vector<1x256xf32>
      %80 = arith.subf %79, %67 : vector<1x256xf32>
      %cst_31 = arith.constant 9.99999997E-7 : f32
      %81 = vector.broadcast %cst_31 : f32 to vector<1x256xf32>
      %82 = arith.addf %80, %81 : vector<1x256xf32>
      %83 = math.log %82 : vector<1x256xf32>
      %cst_32 = arith.constant 0.000000e+00 : f32
      %84 = vector.broadcast %cst_32 : f32 to vector<1x256xf32>
      %85 = arith.subf %84, %83 : vector<1x256xf32>
      %c0_33 = arith.constant 0 : index
      %c0_34 = arith.constant 0 : index
      %c0_35 = arith.constant 0 : index
      %86 = vector.load %arg7[%c0_33, %c0_34, %c0_35] : memref<1x1x1xf32, #tpu.memory_space<vmem>>, vector<1x1x1xf32>
      %87 = vector.shape_cast %86 : vector<1x1x1xf32> to vector<1x1xf32>
      %88 = vector.shape_cast %85 : vector<1x256xf32> to vector<1x1x256xf32>
      %cst_36 = arith.constant dense<0.000000e+00> : vector<1xf32>
      %89 = vector.multi_reduction <add>, %88, %cst_36 [1, 2] : vector<1x1x256xf32> to vector<1xf32>
      %90 = vector.shape_cast %89 : vector<1xf32> to vector<1x1x1xf32>
      %91 = vector.extract %90[0, 0, 0] : f32 from vector<1x1x1xf32>
      %92 = vector.broadcast %91 : f32 to vector<1x1xf32>
      %93 = arith.addf %87, %92 : vector<1x1xf32>
      %c0_37 = arith.constant 0 : index
      %c0_38 = arith.constant 0 : index
      %c0_39 = arith.constant 0 : index
      %94 = vector.load %arg7[%c0_37, %c0_38, %c0_39] : memref<1x1x1xf32, #tpu.memory_space<vmem>>, vector<1x1x1xf32>
      %95 = vector.shape_cast %94 : vector<1x1x1xf32> to vector<1x1xf32>
      %96 = vector.shape_cast %93 : vector<1x1xf32> to vector<1x1x1xf32>
      tpu.vector_store %arg7[%c0_37, %c0_38, %c0_39], %96 {strides = array<i32>} : memref<1x1x1xf32, #tpu.memory_space<vmem>>, vector<1x1x1xf32>,
    } else {
    }
    %73 = vector.extract_strided_slice %1 {offsets = [3, 0], sizes = [1, 256], strides = [1, 1]} : vector<4x256xf32> to vector<1x256xf32>
    %74 = arith.index_cast %arg0 : i32 to index
    %c3 = arith.constant 3 : index
    %75 = memref.load %arg1[%74, %c3] : memref<2x4xi32, #tpu.memory_space<smem>>
    %c0_i32_28 = arith.constant 0 : i32
    %76 = arith.cmpi ne, %75, %c0_i32_28 : i32
    %77 = arith.extui %76 : i1 to i32
    %c0_i32_29 = arith.constant 0 : i32
    %78 = arith.cmpi ne, %77, %c0_i32_29 : i32
    scf.if %78 {
      %cst_30 = arith.constant 1.000000e+00 : f32
      %79 = vector.broadcast %cst_30 : f32 to vector<1x256xf32>
      %80 = arith.subf %79, %73 : vector<1x256xf32>
      %cst_31 = arith.constant 9.99999997E-7 : f32
      %81 = vector.broadcast %cst_31 : f32 to vector<1x256xf32>
      %82 = arith.addf %80, %81 : vector<1x256xf32>
      %83 = math.log %82 : vector<1x256xf32>
      %cst_32 = arith.constant 0.000000e+00 : f32
      %84 = vector.broadcast %cst_32 : f32 to vector<1x256xf32>
      %85 = arith.subf %84, %83 : vector<1x256xf32>
      %c0_33 = arith.constant 0 : index
      %c0_34 = arith.constant 0 : index
      %c0_35 = arith.constant 0 : index
      %86 = vector.load %arg7[%c0_33, %c0_34, %c0_35] : memref<1x1x1xf32, #tpu.memory_space<vmem>>, vector<1x1x1xf32>
      %87 = vector.shape_cast %86 : vector<1x1x1xf32> to vector<1x1xf32>
      %88 = vector.shape_cast %85 : vector<1x256xf32> to vector<1x1x256xf32>
      %cst_36 = arith.constant dense<0.000000e+00> : vector<1xf32>
      %89 = vector.multi_reduction <add>, %88, %cst_36 [1, 2] : vector<1x1x256xf32> to vector<1xf32>
      %90 = vector.shape_cast %89 : vector<1xf32> to vector<1x1x1xf32>
      %91 = vector.extract %90[0, 0, 0] : f32 from vector<1x1x1xf32>
      %92 = vector.broadcast %91 : f32 to vector<1x1xf32>
      %93 = arith.addf %87, %92 : vector<1x1xf32>
      %c0_37 = arith.constant 0 : index
      %c0_38 = arith.constant 0 : index
      %c0_39 = arith.constant 0 : index
      %94 = vector.load %arg7[%c0_37, %c0_38, %c0_39] : memref<1x1x1xf32, #tpu.memory_space<vmem>>, vector<1x1x1xf32>
      %95 = vector.shape_cast %94 : vector<1x1x1xf32> to vector<1x1xf32>
      %96 = vector.shape_cast %93 : vector<1x1xf32> to vector<1x1x1xf32>
      tpu.vector_store %arg7[%c0_37, %c0_38, %c0_39], %96 {strides = array<i32>} : memref<1x1x1xf32, #tpu.memory_space<vmem>>, vector<1x1x1xf32>,
    } else {
    }
    return
  }
  func.func @transform_0(%arg0: i32) -> (i32, i32) {
    %c0_i32 = arith.constant 0 : i32
    %c0_i32_0 = arith.constant 0 : i32
    %c0_i32_1 = arith.constant 0 : i32
    return %c0_i32, %c0_i32_0 : i32, i32
  }
  func.func @transform_1(%arg0: i32) -> (i32, i32) {
    %c0_i32 = arith.constant 0 : i32
    %c0_i32_0 = arith.constant 0 : i32
    %c0_i32_1 = arith.constant 0 : i32
    return %c0_i32, %c0_i32_0 : i32, i32
  }
  func.func @transform_2(%arg0: i32) -> (i32, i32, i32) {
    %c0_i32 = arith.constant 0 : i32
    %c0_i32_0 = arith.constant 0 : i32
    %c0_i32_1 = arith.constant 0 : i32
    return %arg0, %c0_i32, %c0_i32_0 : i32, i32, i32
  }
  func.func @transform_3(%arg0: i32) -> (i32, i32, i32) {
    %c0_i32 = arith.constant 0 : i32
    %c0_i32_0 = arith.constant 0 : i32
    %c0_i32_1 = arith.constant 0 : i32
    return %arg0, %c0_i32, %c0_i32_0 : i32, i32, i32
  }
  func.func @transform_4(%arg0: i32) -> (i32, i32, i32) {
    %c0_i32 = arith.constant 0 : i32
    %c0_i32_0 = arith.constant 0 : i32
    %c0_i32_1 = arith.constant 0 : i32
    return %arg0, %c0_i32, %c0_i32_0 : i32, i32, i32
  }
  func.func @transform_5(%arg0: i32) -> (i32, i32, i32) {
    %c0_i32 = arith.constant 0 : i32
    %c0_i32_0 = arith.constant 0 : i32
    %c0_i32_1 = arith.constant 0 : i32
    return %arg0, %c0_i32, %c0_i32_0 : i32, i32, i32
  }
  func.func @transform_6(%arg0: i32) -> (i32, i32, i32) {
    %c0_i32 = arith.constant 0 : i32
    %c0_i32_0 = arith.constant 0 : i32
    %c0_i32_1 = arith.constant 0 : i32
    return %arg0, %c0_i32, %c0_i32_0 : i32, i32, i32
  }
}

</mosaic_0001>

<bundles_post_ra>
// kernel: tpu_custom_call.1
= control target key start
LH: loop header
LB: loop body
LE: loop exit
PB: predicated region body
PF: predicated region fallthrough
CT: control target
= control target key end

     0   :  { %12 = vsyncpa [#allocation4], 0  ;;  %s1297_s0 = inlined_call_operand.hbm [shape: s32[2,4], index: 0, kind: input, shape index: {}]   ;;  %s1298_s1 = inlined_call_operand.hbm [shape: s32[1,256], index: 1, kind: input, shape index: {}]   ;;  %s1299_s2 = inlined_call_operand.hbm [shape: f32[2,4,256], index: 2, kind: input, shape index: {}]   ;;  %s1300_s3 = inlined_call_operand.vmem [shape: s32[2,1,256], index: 3, kind: input, shape index: {}]   ;;  %s1301_s4 = inlined_call_operand.vmem [shape: f32[2,4,1], index: 4, kind: output, shape index: {0}]   ;;  %s1302_s5 = inlined_call_operand.vmem [shape: f32[2,4,1], index: 5, kind: output, shape index: {1}]   ;;  %s1303_s6 = inlined_call_operand.vmem [shape: f32[2,1,1], index: 6, kind: output, shape index: {2}]  }
   0x1   :  { %13 = vsyncpa [#allocation3], 0 }
   0x2   :  { %14 = vsyncpa [#allocation7], 0 }
   0x3   :  { %16 = vsyncpa [#allocation7 + $0x1], 0  ;;  %s1074_s21 = smov 0   ;;  %s1076_s22 = smov 0  }
   0x4   :  { %s1078_s23 = smov 0   ;;  %s1080_s24 = smov 0  }
   0x5 LB: > { %s1093_s25 = sadd.s32 4294967295, %s1027_s24   ;;  %p84_p0 = scmp.ne.s32.totalorder %s1019_s22, %s1015_s21  ;;  %s1027_s24 = sphi %s1080_s24, %s1321_s24   ;;  %s1023_s23 = sphi %s1078_s23, %s1320_s23   ;;  %s1019_s22 = sphi %s1076_s22, %s1319_s22   ;;  %s1015_s21 = sphi %s1074_s21, %s1318_s21  }
   0x6   : > { %p1304_p1 = scmp.eq.s32.totalorder %s1093_s25, 0  ;;  %p815_p2 = scmp.ge.s32.totalorder %s1027_s24, 1 }
   0x7   : > { %p199_p3 = scmp.lt.s32.totalorder %s1027_s24, 3  ;;  %s1029_s28 = smov [#allocation5]  }
   0x8   : > { %p1101_p4 = por %p1304_p1, %p84_p0  ;;  %s221_s29 = sshll.u32 %s1029_s28, 4  ;;  %s222_s29 = int_to_ptr.vmem [resolvable:$true] %s221_s29 }
   0x9   : > { %p1105_p5 = pnand %p815_p2, %p199_p3  ;;  %s1118_s7 = sadd.s32 1, %s1027_s24  }
   0xa   : > { %s1307_s26 = scalar_select %p1101_p4, 1, 0 }
   0xb   : > { %s1308_s27 = scalar_select %p1105_p5, 1, 0 }
   0xc   : > { %p857_p6 = pneg %p1105_p5  ;;  %s68_s8 = ssub.s32 %s1027_s24, %s1118_s7 }
   0xd   : > { %s71_s9 = sadd.s32 1, %s1023_s23  ;;  %p1123_p8 = scmp.eq.s32.totalorder %s68_s8, 0 }
   0xe   : > { %p1113_p7 = pnand %p857_p6, %p1304_p1  ;;  %s1030_s11 = smov [#allocation2]  }
   0xf   : > { %s942_s14 = scalar_lea.vmem %s222_s29, 32  ;;  %p950_p13 = scmp.lt.s32.totalorder %s222_s29, %s222_s29 }
  0x10   : > { %860 = dma.hbm_to_smem (!%p1113_p7), %s1297_s0, 32, %s1030_s11, [#allocation4]  }
  0x11   : > { %p933_p9 = pneg %p1113_p7  ;;  %p943_p10 = scmp.ne.s32.totalorder %s222_s29, %s942_s14 }
  0x12   : > { %p951_p0 = scmp.lt.s32.totalorder %s942_s14, %s942_s14 }
  0x13   : > { %p945_p11 = pnand %p943_p10, %p933_p9 }
  0x14   : > { %p952_p2 = por %p951_p0, %p950_p13 }
  0x15   : > { %p946_p12 = pneg %p945_p11 }
  0x17   : > { %p953_p3 = pnand %p952_p2, %p946_p12 }
  0x19   : > { %956 = shalt.err (!%p953_p3)
}
  0x1a   : > { %863 = dma.hbm_to_vmem [thread:$0]  (!%p1113_p7), %s1298_s1, 32, %s222_s29, [#allocation3]  }
  0x1b   : > { %s1142_s17 = scalar_select %p1123_p8, %s1023_s23, %s71_s9  }
  0x1c   : > { %p78_p6 = scmp.ne.s32.totalorder %s1023_s23, %s1019_s22  ;;  %p79_p9 = scmp.eq.s32.totalorder %s1027_s24, 0 }
  0x1d   : > { %p870_p10 = scmp.lt.s32.totalorder %s1027_s24, 2  ;;  %s232_s18 = sand.u32 1, %s1023_s23  }
  0x1e   : > { %p80_p11 = por %p79_p9, %p78_p6  ;;  %s819_s19 = sshll.u32 %s232_s18, 3 }
  0x1f   : > { %s838_s20 = sshll.u32 %s1027_s24, 7  ;;  %s236_s8 = scalar_lea.vmem [#allocation6], %s819_s19 }
  0x20   : > { %s1153_s30 = scalar_lea.hbm %s1299_s2, %s838_s20  ;;  %s244_s29 = sshll.u32 %s236_s8, 4  ;;  %s245_s29 = int_to_ptr.vmem [resolvable:$true] %s244_s29 }
  0x21   : > { %p1155_p7 = pnand %p870_p10, %p80_p11  ;;  %s233_s10 = scalar_lea.sflag [#allocation7], %s232_s18 }
  0x22   : > { %s957_s11 = scalar_lea.hbm %s1153_s30, 128  ;;  %s962_s13 = scalar_lea.hbm %s1299_s2, 256 }
  0x23   : > { %p958_p8 = scmp.ne.s32.totalorder %s1153_s30, %s957_s11  ;;  %p959_p12 = pneg %p1155_p7 }
  0x24   : > { %p963_p2 = scmp.lt.s32.totalorder %s1153_s30, %s1299_s2  ;;  %p964_p3 = scmp.lt.s32.totalorder %s962_s13, %s957_s11 }
  0x25   : > { %p960_p13 = pnand %p959_p12, %p958_p8 }
  0x26   : > { %p965_p6 = por %p964_p3, %p963_p2 }
  0x27   : > { %p961_p0 = pneg %p960_p13 }
  0x29   : > { %p966_p9 = pnand %p965_p6, %p961_p0 }
  0x2b   : > { %969 = shalt.err (!%p966_p9)
}
  0x2c   : > { %s970_s16 = scalar_lea.vmem %s245_s29, 128  ;;  %s1031_s18 = smov [#allocation6]  }
  0x2d   : > { %p971_p10 = scmp.ne.s32.totalorder %s245_s29, %s970_s16  ;;  %s975_s19 = sshll.u32 %s1031_s18, 4  ;;  %s976_s19 = int_to_ptr.vmem [resolvable:$false] %s975_s19 }
  0x2e   : > { %s977_s20 = scalar_lea.vmem %s976_s19, 256  ;;  %p978_p8 = scmp.lt.s32.totalorder %s245_s29, %s976_s19 }
  0x2f   : > { %p973_p11 = pnand %p971_p10, %p959_p12  ;;  %p979_p13 = scmp.lt.s32.totalorder %s977_s20, %s970_s16 }
  0x31   : > { %p974_p1 = pneg %p973_p11  ;;  %p980_p4 = por %p979_p13, %p978_p8 }
  0x33   : > { %p981_p5 = pnand %p980_p4, %p974_p1 }
  0x35   : > { %984 = shalt.err (!%p981_p5)
}
  0x36   : > { %867 = dma.hbm_to_vmem [thread:$0]  (!%p1155_p7), %s1153_s30, 128, %s245_s29, %s233_s10  }
  0x37   : > { %p1312_p0 = scmp.ne.s32.totalorder %s1308_s27, 0 }
  0x38   : > { %p1313_p2 = scmp.eq.s32.totalorder (!%p1312_p0), %s1093_s25, 0 }
  0x39   : > { %260 = sbr.rel (%p1312_p0) target bundleno = 1272 (0x4f8), region = 36 }
  0x3e   : > { %1002 = dma.done.wait (%p1313_p2), [#allocation4], 32   ;;  %p1314_p12 = pmov %p1313_p2 }
  0x3f   : > { %p1315_p3 = pmov %p1313_p2 }
  0x40   : > { %1004 = vsyncadd (%p1314_p12), [#allocation4], 4294967264 }
  0x41   : > { %1006 = dma.done.wait (%p1315_p3), [#allocation3], 32   ;;  %p1316_p6 = pmov %p1313_p2 }
  0x42   : > { %s270_s21 = sand.u32 1, %s1019_s22   ;;  %p1317_p1 = scmp.ne.s32.totalorder %s1307_s26, 0 }
  0x43   : > { %1008 = vsyncadd (%p1316_p6), [#allocation3], 4294967264  ;;  %s825_s28 = sshll.u32 %s270_s21, 3  ;;  %s271_s30 = scalar_lea.sflag [#allocation7], %s270_s21 }
  0x44   : > { %s274_s8 = scalar_lea.vmem [#allocation6], %s825_s28 }
  0x45   : > { %1010 = dma.done.wait (%p1317_p1), %s271_s30, 128  }
  0x46   : > { %1012 = vsyncadd (%p1317_p1), %s271_s30, 4294967168 }
  0x47   : > { %279 = sfence }
  0x48   : > { %v1188_v0 = vld [vmem:[%s274_s8] sm:$0xff]  ;;  %v331_v1 = vlaneseq  ;;  %s1032_s27 = smov 112   ;;  %s1033_s29 = smov 16   ;;  %v1036_v32 = vmov 0.0   ;;  %vm355_vm6 = vcmask 1043456   ;;  %v1038_v49 = vmov 286326784  }
  0x49   : > { %v831_v2 = vrot.slane %v1188_v0, 9  ;;  %s1034_s26 = smov 1   ;;  %s1035_s9 = smov 127   ;;  %v363_v31 = vmul.f32 %v1188_v0, %v1188_v0  ;;  %v1037_v46 = vmov 1966171168   ;;  %v493_v50 = vunpack.c.l.s4 %v1038_v49 }
  0x4a   : > { %v1191_v3 = vshrl.u32 %v331_v1, 7  ;;  %v1196_v9 = vand.u32 127, %v331_v1  ;;  %p314_p4 = scmp.lt.s32.totalorder %s1093_s25, 1  ;;  %v449_v47 = vunpack.c.l.s4 %v1037_v46  ;;  %v377_v57 = vld [vmem:[#allocation5] sm:$0x3]  ;;  %vm526_vm11 = vcmask 1040384  }
  0x4b   : > { %v382_v4 = vadd.f32 %v831_v2, %v1188_v0  ;;  %v494_v54 = vunpack.c.0.s8 %v493_v50  ;;  %vm426_vm9 = vcmp.gt.s32.totalorder %v377_v57, 0  ;;  %vm464_vm10 = vcmp.lt.s32.totalorder %v377_v57, 15  ;;  %s1238_s15 = sshll.u32 %s1093_s25, 7 }
  0x4c   : > { %v335_v5 = vsub.s32 0, %v1191_v3  ;;  %v392_v6 = vsub.s32 4, %v1191_v3  ;;  %v376_v10 = vadd.s32 128, %v1196_v9  ;;  %vm411_vm0 = vcmp.lt.s32.totalorder %v1196_v9, 112  ;;  %s1208_s10 = scalar_select %p314_p4, %s1093_s25, 1 }
  0x4d   : > { %vm400_vm1 = vcmp.lt.s32.totalorder %v1196_v9, 16  ;;  %vm383_vm3 = vcmp.ge.s32.totalorder %v1196_v9, 16  ;;  %v339_v27 = vsub.s32 1, %v1191_v3  ;;  %v450_v48 = vunpack.c.0.s8 %v449_v47  ;;  %s543_s20 = sadd.s32 1, %s1238_s15 }
  0x4e   : > { %v389_v7 = vrot.slane %v382_v4, %v335_v5  ;;  %v393_v8 = vrot.slane %v382_v4, %v392_v6  ;;  %vm406_vm2 = vcmp.lt.s32.totalorder %v376_v10, 240  ;;  %s826_s11 = sshll.u32 %s1208_s10, 1  ;;  %vm442_vm7 = vcmp.lt.s32.totalorder %v1196_v9, 1  ;;  %s827_s14 = sshll.u32 %s1208_s10, 2 }
  0x4f   : > { %s317_s13 = scalar_lea.vmem %s1300_s3, %s826_s11  ;;  %v453_v52 = vsub.s32 %v450_v48, %v1191_v3  ;;  %vm469_vm8 = vcmp.lt.s32.totalorder %v1196_v9, 127  ;;  %v497_v62 = vsub.s32 %v494_v54, %v1191_v3  ;;  %vm361_vm12 = vcmask 3072   ;;  %s321_s19 = scalar_lea.vmem %s1301_s4, %s827_s14 }
  0x50   : > { %407 = vrot.lane.b32.xlu1 %v389_v7, %s1032_s27  ;;  %396 = vrot.lane.b32.xlu0 %v389_v7, %s1033_s29  ;;  %v330_v28 = vld [vmem:[%s317_s13] sm:$0x3]  ;;  %s544_s21 = sld [smem:[#allocation2 + %s543_s20]]  ;;  %s325_s8 = scalar_lea.vmem %s1302_s5, %s827_s14  ;;  %vm540_vm13 = vcmask 0  }
  0x51   : > { %v336_v29 = vrot.slane %v330_v28, %v335_v5  ;;  %v340_v30 = vrot.slane %v330_v28, %v339_v27 }
  0x53   : > { %vm341_vm4 = vcmp.eq.s32.totalorder %v336_v29, %v1191_v3  ;;  %vm342_vm5 = vcmp.eq.s32.totalorder %v340_v30, %v1191_v3 }
  0x54   : > { %409 = vrot.lane.b32.xlu1 %v393_v8, %s1032_s27  ;;  %398 = vrot.lane.b32.xlu0 %v393_v8, %s1033_s29  ;;  %v829_v33 = vsel %vm341_vm4, 1.0, %v1036_v32  ;;  %v830_v34 = vsel %vm342_vm5, 1.0, %v1036_v32  ;;  %s1251_s29 = scalar_lea.vmem %s1303_s6, %s1208_s10 }
  0x55   : > { %v349_v35 = vcombine.low %v829_v33, %v830_v34 }
  0x56   : > { %p833_p5 = scmp.eq.s32.totalorder %s544_s21, 0 }
  0x57   : > { %v364_v36 = vadd.f32 %v363_v31, %v349_v35  ;;  %v351_v37 = vmul.f32 %v349_v35, %v1188_v0 }
  0x59   : > { %v366_v38 = vcombine.high %v364_v36, %v364_v36  ;;  %v368_v39 = vsel %vm355_vm6, %v364_v36, 0.0  ;;  %v353_v41 = vcombine.high %v351_v37, %v351_v37  ;;  %v356_v43 = vsel %vm355_vm6, %v351_v37, 0.0 }
  0x5b   : > { %v369_v40 = vsel %vm355_vm6, %v366_v38, 0.0  ;;  %v357_v44 = vsel %vm355_vm6, %v353_v41, 0.0 }
  0x5c   : > { %v370_v42 = vadd.f32 %v369_v40, %v368_v39  ;;  %v358_v45 = vadd.f32 %v357_v44, %v356_v43 }
  0xc2   : > { %v408_v11 = vpop.permute.xlu1 %407  ;;  %v397_v12 = vpop.permute.xlu0 %396 }
  0xc6   : > { %v410_v13 = vpop.permute.xlu1 %409  ;;  %v399_v14 = vpop.permute.xlu0 %398 }
  0xc7   : > { %v413_v15 = vsel %vm411_vm0, %v410_v13, %v408_v11  ;;  %v401_v16 = vsel %vm400_vm1, %v397_v12, %v399_v14  ;;  %v402_v17 = vsel %vm400_vm1, %v399_v14, %v397_v12  ;;  %v412_v18 = vsel %vm411_vm0, %v408_v11, %v410_v13 }
  0xc8   : > { %v415_v19 = vsel %vm406_vm2, %v413_v15, 0.0  ;;  %v403_v20 = vsel %vm383_vm3, %v402_v17, 0.0  ;;  %v518_v14 = vsub.s32 3, %v1191_v3  ;;  %v522_v15 = vsub.s32 7, %v1191_v3 }
  0xc9   : > { %v418_v21 = vcombine.low %v403_v20, %v401_v16  ;;  %v423_v22 = vcombine.low %v412_v18, %v415_v19 }
  0xcb   : > { %v420_v23 = vadd.f32 %v418_v21, %v382_v4 }
  0xcd   : > { %v1202_v24 = vadd.f32 %v423_v22, %v420_v23 }
  0xcf   : > { %v435_v25 = vrot.slane %v1202_v24, %v392_v6  ;;  %v431_v26 = vrot.slane %v1202_v24, %v335_v5 }
  0xd1   : > { %440 = vrot.lane.b32.xlu1 %v435_v25, %s1034_s26  ;;  %438 = vrot.lane.b32.xlu0 %v431_v26, %s1034_s26 }
  0xd5   : > { %467 = vrot.lane.b32.xlu1 %v435_v25, %s1035_s9  ;;  %465 = vrot.lane.b32.xlu0 %v431_v26, %s1035_s9 }
  0xf9   : > { %359 = vadd.xlane.f32.xlu1 %v358_v45 }
 0x143   : > { %v441_v51 = vpop.permute.xlu1 %440  ;;  %v439_v53 = vpop.permute.xlu0 %438 }
 0x144   : > { %v443_v55 = vsel %vm442_vm7, %v439_v53, %v441_v51  ;;  %v444_v56 = vsel %vm442_vm7, %v441_v51, %v439_v53 }
 0x145   : > { %v447_v58 = vcombine.low %v444_v56, %v443_v55 }
 0x147   : > { %v454_v59 = vrot.slane %v447_v58, %v453_v52  ;;  %v468_v60 = vpop.permute.xlu1 %467  ;;  %v466_v61 = vpop.permute.xlu0 %465 }
 0x148   : > { %v470_v63 = vsel %vm469_vm8, %v466_v61, %v468_v60  ;;  %v471_v1 = vsel %vm469_vm8, %v468_v60, %v466_v61 }
 0x149   : > { %v461_v2 = vrot.slane %v454_v59, %v453_v52  ;;  %v474_v4 = vcombine.low %v470_v63, %v471_v1 }
 0x14b   : > { %v463_v5 = vsel %vm426_vm9, %v461_v2, 0.0  ;;  %v481_v6 = vrot.slane %v474_v4, %v453_v52 }
 0x14c   : > { %v498_v7 = vrot.slane %v463_v5, %v497_v62 }
 0x14d   : > { %v488_v8 = vrot.slane %v481_v6, %v453_v52 }
 0x14e   : > { %v500_v9 = vadd.f32 %v498_v7, %v1202_v24 }
 0x14f   : > { %v490_v10 = vsel %vm464_vm10, %v488_v8, 0.0 }
 0x150   : > { %v508_v11 = vrot.slane %v490_v10, %v497_v62 }
 0x152   : > { %v510_v12 = vadd.f32 %v508_v11, %v500_v9 }
 0x154   : > { %v512_v13 = vrot.slane %v510_v12, 5 }
 0x156   : > { %v514_v16 = vmul.f32 %v512_v13, %v1188_v0 }
 0x158   : > { %v519_v17 = vrot.slane %v514_v16, %v518_v14  ;;  %v523_v18 = vrot.slane %v514_v16, %v522_v15 }
 0x15a   : > { %v527_v19 = vsel %vm526_vm11, %v519_v17, 0.0  ;;  %v528_v20 = vsel %vm526_vm11, %v523_v18, 0.0 }
 0x15b   : > { %v529_v21 = vadd.f32 %v528_v20, %v527_v19 }
 0x15d   : > { %530 = vadd.xlane.f32.xlu0 %v529_v21 }
 0x161   : > { %371 = vadd.xlane.f32.xlu0 %v370_v42 }
 0x182   : > { %v360_v22 = vpop.xlane.xlu1 %359 }
 0x183   : > { %362 = vst.msk [vmem:[%s321_s19] sm:$0xf] %vm361_vm12, %v360_v22 }
 0x1e6   : > { %v531_v23 = vpop.xlane.xlu0 %530 }
 0x1e7   : > { %v532_v24 = vrot.slane %v531_v23, 4 }
 0x1e9   : > { %v533_v25 = vadd.f32 %v532_v24, %v531_v23 }
 0x1ea   : > { %v372_v26 = vpop.xlane.xlu0 %371 }
 0x1eb   : > { %v534_v28 = vrot.slane %v533_v25, 2  ;;  %373 = vst.msk [vmem:[%s325_s8] sm:$0xf] %vm361_vm12, %v372_v26 }
 0x1ed   : > { %v535_v29 = vadd.f32 %v534_v28, %v533_v25 }
 0x1ef   : > { %v536_v30 = vrot.slane %v535_v29, 1 }
 0x1f1   : > { %v537_v31 = vadd.f32 %v536_v30, %v535_v29 }
 0x1f3   : > { %839 = vpush %v537_v31 }
 0x222   : > { %548 = sbr.rel (%p833_p5) target bundleno = 782 (0x30e), region = 52 }
 0x224   : > { %s840_s26 = spop %839 }
 0x225   : > { %v539_v32 = vstv %s840_s26 }
 0x226   : > { %541 = vst.msk [vmem:[%s1251_s29] sm:$0x1] %vm540_vm13, %v539_v32 }
 0x227   : > { %v549_v33 = vsub.f32 1.0, %v1188_v0  ;;  %v562_v37 = vsub.s32 5, %v1191_v3 }
 0x229   : > { %v550_v34 = vadd.f32 1e-06, %v549_v33 }
 0x22b   : > { %914 = vlog2.f32 %v550_v34 }
 0x22d   : > { %v554_v51 = vld [vmem:[%s1251_s29] sm:$0x1] }
 0x238   : > { %v915_v35 = vpop.eup %914 }
 0x239   : > { %v552_v36 = vmul.f32 0.6931472, %v915_v35 }
 0x23b   : > { %v553_v38 = vsub.f32 0.0, %v552_v36 }
 0x23d   : > { %v559_v39 = vrot.slane %v553_v38, %v339_v27  ;;  %v563_v40 = vrot.slane %v553_v38, %v562_v37 }
 0x23f   : > { %v566_v41 = vsel %vm526_vm11, %v559_v39, 0.0  ;;  %v567_v42 = vsel %vm526_vm11, %v563_v40, 0.0 }
 0x240   : > { %v568_v43 = vadd.f32 %v567_v42, %v566_v41 }
 0x242   : > { %569 = vadd.xlane.f32.xlu0 %v568_v43 }
 0x2cb   : > { %v570_v44 = vpop.xlane.xlu0 %569 }
 0x2cc   : > { %v571_v45 = vrot.slane %v570_v44, 4 }
 0x2ce   : > { %v572_v46 = vadd.f32 %v571_v45, %v570_v44 }
 0x2d0   : > { %v573_v47 = vrot.slane %v572_v46, 2 }
 0x2d2   : > { %v574_v48 = vadd.f32 %v573_v47, %v572_v46 }
 0x2d4   : > { %v575_v49 = vrot.slane %v574_v48, 1 }
 0x2d6   : > { %v576_v50 = vadd.f32 %v575_v49, %v574_v48 }
 0x2d8   : > { %841 = vpush %v576_v50 }
 0x309   : > { %s842_s9 = spop %841 }
 0x30a   : > { %v578_v52 = vstv %s842_s9 }
 0x30b   : > { %v579_v27 = vadd.f32 %v578_v52, %v554_v51 }
 0x30d   : > { %580 = vst.msk [vmem:[%s1251_s29] sm:$0x1] %vm540_vm13, %v579_v27 }
 0x30e PF: > { %s581_s10 = sadd.s32 2, %s1238_s15 }
 0x30f   : > { %s582_s11 = sld [smem:[#allocation2 + %s581_s10]] }
 0x315   : > { %p834_p7 = scmp.eq.s32.totalorder %s582_s11, 0 }
 0x317   : > { %586 = sbr.rel (%p834_p7) target bundleno = 1027 (0x403), region = 56 }
 0x31c   : > { %v587_v53 = vsub.f32 1.0, %v1188_v0  ;;  %v596_v57 = vsub.s32 2, %v1191_v3  ;;  %v600_v58 = vsub.s32 6, %v1191_v3  ;;  %v592_v11 = vld [vmem:[%s1251_s29] sm:$0x1] }
 0x31e   : > { %v588_v54 = vadd.f32 1e-06, %v587_v53 }
 0x320   : > { %916 = vlog2.f32 %v588_v54 }
 0x32d   : > { %v917_v55 = vpop.eup %916 }
 0x32e   : > { %v590_v56 = vmul.f32 0.6931472, %v917_v55 }
 0x330   : > { %v591_v59 = vsub.f32 0.0, %v590_v56 }
 0x332   : > { %v597_v60 = vrot.slane %v591_v59, %v596_v57  ;;  %v601_v61 = vrot.slane %v591_v59, %v600_v58 }
 0x334   : > { %v604_v62 = vsel %vm526_vm11, %v597_v60, 0.0  ;;  %v605_v63 = vsel %vm526_vm11, %v601_v61, 0.0 }
 0x335   : > { %v606_v1 = vadd.f32 %v605_v63, %v604_v62 }
 0x337   : > { %607 = vadd.xlane.f32.xlu0 %v606_v1 }
 0x3c0   : > { %v608_v2 = vpop.xlane.xlu0 %607 }
 0x3c1   : > { %v609_v4 = vrot.slane %v608_v2, 4 }
 0x3c3   : > { %v610_v5 = vadd.f32 %v609_v4, %v608_v2 }
 0x3c5   : > { %v611_v6 = vrot.slane %v610_v5, 2 }
 0x3c7   : > { %v612_v7 = vadd.f32 %v611_v6, %v610_v5 }
 0x3c9   : > { %v613_v8 = vrot.slane %v612_v7, 1 }
 0x3cb   : > { %v614_v10 = vadd.f32 %v613_v8, %v612_v7 }
 0x3cd   : > { %843 = vpush %v614_v10 }
 0x3fe   : > { %s844_s24 = spop %843 }
 0x3ff   : > { %v616_v9 = vstv %s844_s24 }
 0x400   : > { %v617_v12 = vadd.f32 %v616_v9, %v592_v11 }
 0x402   : > { %618 = vst.msk [vmem:[%s1251_s29] sm:$0x1] %vm540_vm13, %v617_v12 }
 0x403 PF: > { %s619_s12 = sadd.s32 3, %s1238_s15 }
 0x404   : > { %s620_s13 = sld [smem:[#allocation2 + %s619_s12]] }
 0x40a   : > { %p835_p9 = scmp.eq.s32.totalorder %s620_s13, 0 }
 0x40c   : > { %624 = sbr.rel (%p835_p9) target bundleno = 1272 (0x4f8), region = 60 }
 0x411   : > { %v625_v13 = vsub.f32 1.0, %v1188_v0  ;;  %v630_v32 = vld [vmem:[%s1251_s29] sm:$0x1] }
 0x413   : > { %v626_v16 = vadd.f32 1e-06, %v625_v13 }
 0x415   : > { %918 = vlog2.f32 %v626_v16 }
 0x422   : > { %v919_v17 = vpop.eup %918 }
 0x423   : > { %v628_v18 = vmul.f32 0.6931472, %v919_v17 }
 0x425   : > { %v629_v19 = vsub.f32 0.0, %v628_v18 }
 0x427   : > { %v635_v20 = vrot.slane %v629_v19, %v518_v14  ;;  %v639_v21 = vrot.slane %v629_v19, %v522_v15 }
 0x429   : > { %v642_v22 = vsel %vm526_vm11, %v635_v20, 0.0  ;;  %v643_v23 = vsel %vm526_vm11, %v639_v21, 0.0 }
 0x42a   : > { %v644_v24 = vadd.f32 %v643_v23, %v642_v22 }
 0x42c   : > { %645 = vadd.xlane.f32.xlu0 %v644_v24 }
 0x4b5   : > { %v646_v0 = vpop.xlane.xlu0 %645 }
 0x4b6   : > { %v647_v25 = vrot.slane %v646_v0, 4 }
 0x4b8   : > { %v648_v26 = vadd.f32 %v647_v25, %v646_v0 }
 0x4ba   : > { %v649_v28 = vrot.slane %v648_v26, 2 }
 0x4bc   : > { %v650_v29 = vadd.f32 %v649_v28, %v648_v26 }
 0x4be   : > { %v651_v30 = vrot.slane %v650_v29, 1 }
 0x4c0   : > { %v652_v31 = vadd.f32 %v651_v30, %v650_v29 }
 0x4c2   : > { %845 = vpush %v652_v31 }
 0x4f3   : > { %s846_s14 = spop %845 }
 0x4f4   : > { %v654_v14 = vstv %s846_s14 }
 0x4f5   : > { %v655_v3 = vadd.f32 %v654_v14, %v630_v32 }
 0x4f7   : > { %656 = vst.msk [vmem:[%s1251_s29] sm:$0x1] %vm540_vm13, %v655_v3 }
 0x4f8 PF: > { %p19_p10 = scmp.ge.s32.totalorder %s1118_s7, 4   ;;  %s1318_s21 = smov %s1019_s22 }
 0x4f9   : > { %s1319_s22 = smov %s1023_s23  ;;  %s1320_s23 = smov %s1142_s17 }
 0x4fa   : > { %s1321_s24 = smov %s1118_s7  ;;  %21 = sbr.rel (!%p19_p10) target bundleno = 5 (0x5), region = 125 }
 0x4ff   :  { %702 = vsyncpa [#allocation3], 1 }
 0x500   :  { %704 = vsyncpa [#allocation3 + $0x1], 1 }
 0x501   :  { %705 = vsyncpa [#allocation7], 1 }
 0x502   :  { %707 = vsyncpa [#allocation7 + $0x1], 1 }
 0x503   :  { %708 = vsyncpa [#allocation4], 1 }
 0x504   :  { %710 = vsyncpa [#allocation4 + $0x1], 1 }

</bundles_post_ra>
